<compile_context>
chip_gen: v7x
topology: tpu7x:2x2x1
jax: 0.10.0
libtpu: 0.0.40
codegen_flags: <defaults>
</compile_context>

<pallas_src>
from functools import partial

import jax
import jax.numpy as jnp
from jax.experimental import pallas as pl
from jax.experimental.pallas import tpu as pltpu


NEG_SLOPE = 0.01   # nn.LeakyReLU default negative_slope
_MAX_TM = 4096     # upper bound on the M (lane-axis) tile


def _conv_mm_kernel(w_ref, p_ref, b_ref, o_ref):
    # w_ref: (n_out, K) bf16 ; p_ref: (K, TM) bf16 ; b_ref: (n_out, 1) f32
    # o_ref: (n_out, TM) f32 -- M on the lane axis => lane-dense stores.
    acc = jnp.dot(w_ref[...], p_ref[...], preferred_element_type=jnp.float32)
    acc = acc + b_ref[...]                                   # broadcast over lanes
    o_ref[...] = jnp.where(acc > 0, acc, NEG_SLOPE * acc).astype(o_ref.dtype)


def _round_up(v, m):
    return ((v + m - 1) // m) * m


def _choose_tm(M, K, n_out):
    """Pick the M (lane-axis) tile.

    Prefers (a) big tiles (per-grid-step overhead ~0.35us, wider unmasked
    stores), (b) >= 2 roughly even steps when M allows it (v7x has 2
    TensorCores and the M axis is marked "parallel"), (c) a tile that fits a
    conservative VMEM budget assuming double-buffered cols/out tiles (safe
    against v7x's 64 MiB physical / 32 MiB scoped VMEM).
    """
    vmem_budget = 24 << 20
    per_col = 2 * (K * 2 + n_out * 4)          # double-buffered bf16 cols + f32 out
    fixed = 2 * (n_out * K * 2 + n_out * 4)    # resident weight + bias (tiny)
    cap = (vmem_budget - fixed) // max(per_col, 1)
    cap = max(128, (cap // 128) * 128)
    hard_max = min(_MAX_TM, cap)

    M128 = _round_up(M, 128)
    # ~2 evenly sized steps unless M is a single 128-lane tile or very large.
    return min(hard_max, max(128, _round_up(pl.cdiv(M128, 2), 128)))


@partial(jax.jit, static_argnames=("stride", "padding"))
def leaky_relu_conv2d(x, weight, bias, stride, padding):
    """x: (N, C, H, W); weight: (n_out, C, kh, kw); bias: (n_out,). Returns NCHW f32."""
    N, C, H, W = x.shape
    n_out, _, kh, kw = weight.shape
    s = stride

    # --- glue: reflection pad + im2col, emitted in bf16 and (K, M) layout ---
    xb = x.astype(jnp.bfloat16)
    if padding > 0:
        xb = jnp.pad(
            xb, ((0, 0), (0, 0), (padding, padding), (padding, padding)),
            mode="reflect")
    Hp, Wp = H + 2 * padding, W + 2 * padding
    Ho = (Hp - kh) // s + 1
    Wo = (Wp - kw) // s + 1
    K = C * kh * kw
    M = N * Ho * Wo

    # Transpose the small, un-expanded input once so im2col lands as (K, M) with
    # K ordered (c, i, j) -- matching weight.reshape(n_out, K) -- and M ordered
    # (n, ho, wo). The reshape below is contiguous (no extra transpose pass).
    x_cn = jnp.transpose(xb, (1, 0, 2, 3))                    # (C, N, Hp, Wp)
    cols = jnp.stack(
        [x_cn[:, :, i:i + Ho * s:s, j:j + Wo * s:s]
         for i in range(kh) for j in range(kw)],
        axis=1,
    )                                                         # (C, kh*kw, N, Ho, Wo)
    cols = cols.reshape(K, M)                                 # bf16 (K, M)
    # TODO(synk): fully fusing patch extraction into the kernel (kh*kw shifted
    # dots on manually DMA'd padded-input rows) would remove the remaining
    # kh*kw x im2col HBM traffic; kept as XLA glue since blocked BlockSpecs
    # cannot express the overlapping row windows.

    w_mat = weight.reshape(n_out, K).astype(jnp.bfloat16)     # (n_out, K)
    b_mat = bias.reshape(n_out, 1).astype(jnp.float32)        # (n_out, 1)

    tm = _choose_tm(M, K, n_out)
    grid_m = pl.cdiv(M, tm)
    M_pad = grid_m * tm
    if M_pad != M:                                            # ragged tail only
        cols = jnp.pad(cols, ((0, 0), (0, M_pad - M)))

    out = pl.pallas_call(
        _conv_mm_kernel,
        out_shape=jax.ShapeDtypeStruct((n_out, M_pad), jnp.float32),
        grid_spec=pltpu.PrefetchScalarGridSpec(
            num_scalar_prefetch=0,
            grid=(grid_m,),
            in_specs=[
                pl.BlockSpec((n_out, K), lambda i: (0, 0)),   # weight (grid-invariant)
                pl.BlockSpec((K, tm), lambda i: (0, i)),      # patch columns
                pl.BlockSpec((n_out, 1), lambda i: (0, 0)),   # bias (grid-invariant)
            ],
            out_specs=pl.BlockSpec((n_out, tm), lambda i: (0, i)),
        ),
        compiler_params=pltpu.CompilerParams(
            dimension_semantics=("parallel",),                # megacore-shardable on v7x
            vmem_limit_bytes=32 << 20,                        # explicit; fits v5e/v6e/v7x
        ),
    )(w_mat, cols, b_mat)

    if M_pad != M:
        out = out[:, :M]
    # (n_out, N*Ho*Wo) -> (N, n_out, Ho, Wo): cheap leading-axis swap on the
    # small output tensor (negligible vs the GEMM / im2col traffic).
    return out.reshape(n_out, N, Ho, Wo).transpose(1, 0, 2, 3)


if __name__ == "__main__":
    # LeakyReLUConv2d(n_in=4, n_out=8, kernel_size=3, stride=1, padding=1)
    n_in, n_out, ksize, stride, padding = 4, 8, 3, 1, 1
    key = jax.random.PRNGKey(0)
    kx, kwt, kb = jax.random.split(key, 3)

    x = jax.random.normal(kx, (2, n_in, 16, 16), dtype=jnp.float32)
    # gaussian_weights_init: weight ~ Normal(0, 0.02); bias: default Conv2d init.
    weight = 0.02 * jax.random.normal(kwt, (n_out, n_in, ksize, ksize), jnp.float32)
    fan_in = n_in * ksize * ksize
    bound = 1.0 / (fan_in ** 0.5)
    bias = jax.random.uniform(kb, (n_out,), jnp.float32, -bound, bound)

    y = leaky_relu_conv2d(x, weight, bias, stride=stride, padding=padding)
    y = jax.block_until_ready(y)

    # Reference: reflection pad + f32 conv + bias + LeakyReLU. Kernel uses bf16
    # operands with f32 accumulation, so tolerances are loosened accordingly.
    xp = jnp.pad(x, ((0, 0), (0, 0), (padding, padding), (padding, padding)),
                 mode="reflect")
    ref = jax.lax.conv_general_dilated(
        xp, weight, window_strides=(stride, stride), padding="VALID",
        dimension_numbers=("NCHW", "OIHW", "NCHW"))
    ref = ref + bias.reshape(1, n_out, 1, 1)
    ref = jnp.where(ref > 0, ref, NEG_SLOPE * ref)

    assert y.shape == (2, n_out, 16, 16)
    assert jnp.allclose(y, ref, atol=1e-2, rtol=1e-2), \
        float(jnp.max(jnp.abs(y - ref)))

    print("KERNEL_OK")
</pallas_src>

<mosaic_0001>
module attributes {stable_mosaic.version = 11 : i64} {
  func.func @_conv_mm_kernel(%arg0: i32, %arg1: memref<8x36xbf16, #tpu.memory_space<vmem>>, %arg2: memref<36x256xbf16, #tpu.memory_space<vmem>>, %arg3: memref<8x1xf32, #tpu.memory_space<vmem>>, %arg4: memref<8x256xf32, #tpu.memory_space<vmem>>) attributes {dimension_semantics = [#tpu.dimension_semantics<parallel>], iteration_bounds = array<i64: 2>, scalar_prefetch = 0 : i64, scratch_operands = 0 : i64, tpu.core_type = #tpu.core_type<tc>, window_params = [{pipeline_mode = #tpu.pipeline_mode<synchronous>, transform_indices = @transform_0, window_bounds = array<i64: 8, 36>}, {transform_indices = @transform_1, window_bounds = array<i64: 36, 256>}, {pipeline_mode = #tpu.pipeline_mode<synchronous>, transform_indices = @transform_2, window_bounds = array<i64: 8, 1>}, {transform_indices = @transform_3, window_bounds = array<i64: 8, 256>}]} {
    %c0 = arith.constant 0 : index
    %c0_0 = arith.constant 0 : index
    %0 = vector.load %arg1[%c0, %c0_0] : memref<8x36xbf16, #tpu.memory_space<vmem>>, vector<8x36xbf16>
    %c0_1 = arith.constant 0 : index
    %c0_2 = arith.constant 0 : index
    %1 = vector.load %arg2[%c0_1, %c0_2] : memref<36x256xbf16, #tpu.memory_space<vmem>>, vector<36x256xbf16>
    %cst = arith.constant dense<0.000000e+00> : vector<8x256xf32>
    %2 = tpu.matmul %0, %1, %cst {dimension_numbers = #tpu.dot_dimension_numbers<[1], [0], [0], [1], [0, 0, 1, 1], [], []>} : vector<8x36xbf16>, vector<36x256xbf16>, vector<8x256xf32> -> vector<8x256xf32>
    %c0_3 = arith.constant 0 : index
    %c0_4 = arith.constant 0 : index
    %3 = vector.load %arg3[%c0_3, %c0_4] : memref<8x1xf32, #tpu.memory_space<vmem>>, vector<8x1xf32>
    %4 = vector.broadcast %3 : vector<8x1xf32> to vector<8x256xf32>
    %5 = arith.addf %2, %4 : vector<8x256xf32>
    %cst_5 = arith.constant 0.000000e+00 : f32
    %6 = vector.broadcast %cst_5 : f32 to vector<8x256xf32>
    %7 = arith.cmpf ogt, %5, %6 : vector<8x256xf32>
    %cst_6 = arith.constant 0.00999999977 : f32
    %8 = vector.broadcast %cst_6 : f32 to vector<8x256xf32>
    %9 = arith.mulf %8, %5 : vector<8x256xf32>
    %10 = arith.select %7, %5, %9 : vector<8x256xi1>, vector<8x256xf32>
    %c0_7 = arith.constant 0 : index
    %c0_8 = arith.constant 0 : index
    %11 = vector.load %arg4[%c0_7, %c0_8] : memref<8x256xf32, #tpu.memory_space<vmem>>, vector<8x256xf32>
    tpu.vector_store %arg4[%c0_7, %c0_8], %10 {strides = array<i32>} : memref<8x256xf32, #tpu.memory_space<vmem>>, vector<8x256xf32>,
    return
  }
  func.func @transform_0(%arg0: i32) -> (i32, i32) {
    %c0_i32 = arith.constant 0 : i32
    %c0_i32_0 = arith.constant 0 : i32
    %c0_i32_1 = arith.constant 0 : i32
    return %c0_i32, %c0_i32_0 : i32, i32
  }
  func.func @transform_1(%arg0: i32) -> (i32, i32) {
    %c0_i32 = arith.constant 0 : i32
    %c0_i32_0 = arith.constant 0 : i32
    return %c0_i32, %arg0 : i32, i32
  }
  func.func @transform_2(%arg0: i32) -> (i32, i32) {
    %c0_i32 = arith.constant 0 : i32
    %c0_i32_0 = arith.constant 0 : i32
    %c0_i32_1 = arith.constant 0 : i32
    return %c0_i32, %c0_i32_0 : i32, i32
  }
  func.func @transform_3(%arg0: i32) -> (i32, i32) {
    %c0_i32 = arith.constant 0 : i32
    %c0_i32_0 = arith.constant 0 : i32
    return %c0_i32, %arg0 : i32, i32
  }
}

</mosaic_0001>

<bundles_post_ra>
// kernel: leaky_relu_conv2d.1
= control target key start
LH: loop header
LB: loop body
LE: loop exit
PB: predicated region body
PF: predicated region fallthrough
CT: control target
= control target key end

     0   :  { %s485_s12 = smov 0   ;;  %s487_s13 = smov 0   ;;  %s543_s0 = inlined_call_operand.vmem [shape: bf16[8,36], index: 0, kind: input, shape index: {}]   ;;  %s544_s1 = inlined_call_operand.vmem [shape: bf16[36,512], index: 1, kind: input, shape index: {}]   ;;  %s545_s2 = inlined_call_operand.vmem [shape: f32[8,1], index: 2, kind: input, shape index: {}]   ;;  %s546_s3 = inlined_call_operand.vmem [shape: f32[8,512], index: 3, kind: output, shape index: {}]  }
   0x1   :  { %s489_s14 = smov 0  }
   0x2 LB: > { %s384_s15 = sadd.s32 4294967295, %s462_s14   ;;  %s502_s16 = sadd.s32 1, %s462_s14   ;;  %s462_s14 = sphi %s489_s14, %s549_s14   ;;  %s458_s13 = sphi %s487_s13, %s548_s13   ;;  %s454_s12 = sphi %s485_s12, %s547_s12  }
   0x3   : > { %s38_s17 = ssub.s32 %s462_s14, %s502_s16  ;;  %s41_s18 = sadd.s32 1, %s458_s13 }
   0x4   : > { %p39_p0 = scmp.eq.s32.totalorder %s38_s17, 0  ;;  %p48_p1 = scmp.ne.s32.totalorder %s458_s13, %s454_s12 }
   0x5   : > { %p49_p2 = scmp.eq.s32.totalorder %s462_s14, 0  ;;  %p387_p4 = scmp.ge.s32.totalorder %s462_s14, 2 }
   0x6   : > { %s511_s19 = scalar_select %p39_p0, %s458_s13, %s41_s18  }
   0x7   : > { %p50_p3 = por %p49_p2, %p48_p1  ;;  %127 = sbr.rel (%p387_p4) target bundleno = 21 (0x15), region = 24 }
   0xe   : > { %130 = sbr.rel (!%p50_p3) target bundleno = 21 (0x15), region = 28  ;;  %s132_s20 = sand.u32 (%p50_p3), 1, %s458_s13  }
   0xf   : > { %s403_s21 = sshll.u32 (%p50_p3), %s462_s14, 3  ;;  %s404_s22 = smul.u32 (%p50_p3), 40, %s132_s20 }
  0x10   : > { %s137_s25 = scalar_lea.vmem (%p50_p3), %s544_s1, %s403_s21 }
  0x11   : > { %v173_v0 = vld [vmem:[%s137_s25] sm:$0xff] (%p50_p3)  ;;  %v175_v1 = vld [vmem:[%s137_s25 + $0x10] sm:$0xff] (%p50_p3)  ;;  %s134_s26 = scalar_lea.vmem (%p50_p3), [#allocation2], %s404_s22 }
  0x12   : > { %v177_v2 = vld [vmem:[%s137_s25 + $0x20] sm:$0xff] (%p50_p3)  ;;  %v179_v3 = vld [vmem:[%s137_s25 + $0x30] sm:$0xff] (%p50_p3)  ;;  %174 = vst [vmem:[%s134_s26] sm:$0xff] (%p50_p3), %v173_v0  ;;  %176 = vst [vmem:[%s134_s26 + $0x8] sm:$0xff] (%p50_p3), %v175_v1 }
  0x13   : > { %v181_v4 = vld [vmem:[%s137_s25 + $0x40] sm:$0xff] (%p50_p3)  ;;  %178 = vst [vmem:[%s134_s26 + $0x10] sm:$0xff] (%p50_p3), %v177_v2  ;;  %180 = vst [vmem:[%s134_s26 + $0x18] sm:$0xff] (%p50_p3), %v179_v3 }
  0x14   : > { %182 = vst [vmem:[%s134_s26 + $0x20] sm:$0xff] (%p50_p3), %v181_v4 }
  0x15 PF: > { %p390_p5 = scmp.ge.s32.totalorder %s462_s14, 1  ;;  %p187_p6 = scmp.lt.s32.totalorder %s462_s14, 3 }
  0x17   : > { %p188_p7 = pnand %p390_p5, %p187_p6 }
  0x18   : > { %s194_s27 = sand.u32 (!%p188_p7), 1, %s454_s12   ;;  %v464_v5 = vmov (!%p188_p7), 0   ;;  %v231_v6 = vld [vmem:[%s545_s2] sm:$0xff] (!%p188_p7)  ;;  %vm266_vm0 = vcmask (!%p188_p7), 1041408   ;;  %vm262_vm1 = vcmask (!%p188_p7), 293888   ;;  %s391_s7 = sshll.u32 (!%p188_p7), %s384_s15, 1 }
  0x19   : > { %191 = sbr.rel (%p188_p7) target bundleno = 261 (0x105), region = 66  ;;  %305 = vmatprep.mubr.bf16.mxu0 (!%p188_p7), %v464_v5  ;;  %431 = vset.pattern.permute.xlu0 (!%p188_p7), %v464_v5  ;;  %v225_v15 = vld [vmem:[%s543_s0] sm:$0xf] (!%p188_p7)  ;;  %p219_p8 = scmp.lt.s32.totalorder (!%p188_p7), %s391_s7, 3 }
  0x1a   : > { %s405_s28 = smul.u32 (!%p188_p7), 40, %s194_s27  ;;  %234 = vperm.xlu0 (!%p188_p7), %431, %v231_v6  }
  0x1c   : > { %s196_s4 = scalar_lea.vmem (!%p188_p7), [#allocation2], %s405_s28 }
  0x1d   : > { %v432_v7 = vld [vmem:[%s196_s4 + $0x4] ss:$8 sps:$4 sm:$0xff] (!%p188_p7)   ;;  %v434_v8 = vld [vmem:[%s196_s4] ss:$8 sps:$4 sm:$0xff] (!%p188_p7)   ;;  %v435_v9 = vld [vmem:[%s196_s4 + $0x14] ss:$8 sps:$4 sm:$0xff] (!%p188_p7)  }
  0x1e   : > { %273 = vmatprep.subr.bf16.mxu0 (!%p188_p7), %v432_v7  ;;  %v230_v10 = vld [vmem:[%s196_s4 + $0x20] sm:$0x33] (!%p188_p7)  ;;  %v437_v11 = vld [vmem:[%s196_s4 + $0x10] ss:$8 sps:$4 sm:$0xff] (!%p188_p7)  }
  0x1f   : > { %274 = vmatpush1.bf16.msra.mxu0 (!%p188_p7), %v434_v8  ;;  %v398_v12 = vcombine.high (!%p188_p7), %v230_v10, %v230_v10  ;;  %v397_v13 = vcombine.low (!%p188_p7), %v230_v10, %v230_v10 }
  0x20   : > { %275 = vmatprep.subr.bf16.mxu0 %v435_v9  ;;  %s551_s7 = smov (!%p219_p8, %s391_s7), 3 }
  0x21   : > { %v268_v14 = vsel %vm266_vm0, %v397_v13, 0  ;;  %s392_s8 = sshll.u32 %s551_s7, 3 }
  0x22   : > { %s222_s11 = scalar_lea.vmem %s546_s3, %s392_s8 }
  0x23   : > { %276 = vmatpush1.bf16.msra.mxu0 %v437_v11 }
  0x24   : > { %399 = vmatprep.subr.msk.bf16.mxu0 %vm266_vm0, %v398_v12 }
  0x27   : > { %278 = vmatpush1.bf16.msra.mxu0 %v268_v14 }
  0x2a   : > { %400 = vmatmul.mubr.msk.bf16.vlgmr.msra.gmra.mrb[0].mxu0 %vm262_vm1, %v225_v15 }
  0x99   : > { %v235_v16 = vpop.permute.xlu0 %234 }
  0xfd   : > { %v307_v17 = vpop.f32.mrb[0].mxu0 }
  0xfe   : > { %v308_v18 = vadd.f32 %v307_v17, %v235_v16  ;;  %v309_v19 = vpop.f32.mrb[1].mxu0 }
  0xff   : > { %v310_v20 = vadd.f32 %v309_v19, %v235_v16  ;;  %v311_v21 = vpop.f32.mrb[2].mxu0 }
 0x100   : > { %vm314_vm2 = vcmp.gt.f32.partialorder %v308_v18, 0.0  ;;  %v316_v22 = vmul.f32 0.01, %v308_v18  ;;  %v312_v23 = vpop.f32.mrb[3].mxu0 }
 0x101   : > { %vm315_vm3 = vcmp.gt.f32.partialorder %v310_v20, 0.0  ;;  %v317_v24 = vmul.f32 0.01, %v310_v20 }
 0x102   : > { %v318_v25 = vsel %vm314_vm2, %v308_v18, %v316_v22 }
 0x103   : > { %320 = vst [vmem:[%s222_s11] sm:$0xff] %v318_v25  ;;  %v319_v26 = vsel %vm315_vm3, %v310_v20, %v317_v24 }
 0x104   : > { %321 = vst [vmem:[%s222_s11 + $0x8] sm:$0xff] %v319_v26 }
 0x105 PF: > { %p10_p9 = scmp.ge.s32.totalorder %s502_s16, 4   ;;  %s547_s12 = smov %s458_s13 }
 0x106   : > { %s548_s13 = smov %s511_s19  ;;  %s549_s14 = smov %s502_s16 }
 0x107   :  { %12 = sbr.rel (!%p10_p9) target bundleno = 2 (0x2), region = 105 }

</bundles_post_ra>
